<compile_context>
chip_gen: v5e
topology: v5e:2x2
jax: 0.10.0
libtpu: 0.0.40
codegen_flags: <defaults>
</compile_context>

<pallas_src>
import jax
import jax.numpy as jnp
from jax.experimental import pallas as pl
from jax.experimental.pallas import tpu as pltpu

# Constants from the module's forward()
_MIO = 0.5
_A = 1.2
_W = 2.0 * 3.14 / 10.0

_LANES = 128
_SUBLANES = 8


# --------------------------------------------------------------------------
# Batched, dense-plane kernel:
#   t_ref: (TM, 128)   x_ref: (2, TM, 128)   o_ref: (2, TM, 128)
# --------------------------------------------------------------------------
def _vdp_kernel_batched(t_ref, x_ref, o_ref):
    t = t_ref[...]          # (TM, 128) f32, fully dense vregs
    x1 = x_ref[0]           # (TM, 128)
    x2 = x_ref[1]           # (TM, 128)

    # x1_dot == x2: store the row directly (no concatenate, no extra temp).
    o_ref[0] = x2
    # EUP handles sin(); VALU work rides free under the HBM-bound roofline.
    o_ref[1] = _MIO * (1.0 - x1 * x1) * x2 - x1 + _A * jnp.sin(_W * t)


def _batch_axis_semantics(grid_size):
    """Pick grid-axis semantics: CORE_PARALLEL only where it actually helps."""
    try:
        kind = jax.devices()[0].device_kind.lower()
    except Exception:
        kind = ""
    # v7x has 2 TensorCores/chip; CORE_PARALLEL is what actually splits the
    # grid across them.  Plain "parallel"/"arbitrary" have ~zero codegen
    # effect, so single-TC chips keep the safe default.
    if grid_size >= 2 and ("v7" in kind or "7x" in kind):
        return (pltpu.CORE_PARALLEL,)
    return ("arbitrary",)


def vdp_func2_batched(t, x, *, row_tile=2048):
    """Batched VdP RHS.

    t: (N,) float32 times, x: (2, N) float32 states (x1 row 0, x2 row 1).
    Returns y: (2, N) float32 with y[0] = x1_dot, y[1] = x2_dot.
    """
    t = jnp.asarray(t, jnp.float32)
    x = jnp.asarray(x, jnp.float32)
    if x.ndim != 2 or x.shape[0] != 2:
        raise ValueError(f"x must have shape (2, N), got {x.shape}")
    n = x.shape[1]
    if t.shape != (n,):
        raise ValueError(f"t must have shape ({n},), got {t.shape}")

    # --- choose tiling: dense (rows, 128) planes, TM rows per grid step ---
    rows = -(-n // _LANES)                                   # ceil(n / 128)
    rows_min = max(_SUBLANES, -(-rows // _SUBLANES) * _SUBLANES)
    tm = min(int(row_tile), rows_min)
    tm = max(_SUBLANES, (tm // _SUBLANES) * _SUBLANES)       # multiple of 8
    rows_pad = -(-rows // tm) * tm
    n_pad = rows_pad * _LANES

    # Wrapper-side padding (instead of the old whole-array-block fallback).
    if n_pad != n:
        t = jnp.pad(t, (0, n_pad - n))
        x = jnp.pad(x, ((0, 0), (0, n_pad - n)))

    t_planes = t.reshape(rows_pad, _LANES)        # zero-copy re-layout
    x_planes = x.reshape(2, rows_pad, _LANES)     # zero-copy re-layout
    grid = (rows_pad // tm,)

    out = pl.pallas_call(
        _vdp_kernel_batched,
        out_shape=jax.ShapeDtypeStruct((2, rows_pad, _LANES), jnp.float32),
        grid_spec=pltpu.PrefetchScalarGridSpec(
            num_scalar_prefetch=0,
            grid=grid,
            in_specs=[
                pl.BlockSpec((tm, _LANES), lambda i: (i, 0)),        # t plane
                pl.BlockSpec((2, tm, _LANES), lambda i: (0, i, 0)),  # x planes
            ],
            out_specs=pl.BlockSpec((2, tm, _LANES), lambda i: (0, i, 0)),
        ),
        compiler_params=pltpu.CompilerParams(
            dimension_semantics=_batch_axis_semantics(grid[0]),
            # Explicit headroom: double-buffered footprint with TM=2048 is
            # ~10 MiB (t 1 + x 2 + y 2 MiB per step, x2 buffers) -> fits all
            # of v5e/v6e/v7x comfortably under 32 MiB.
            vmem_limit_bytes=32 * 1024 * 1024,
        ),
    )(t_planes, x_planes)

    y = out.reshape(2, n_pad)
    if n_pad != n:
        y = y[:, :n]
    return y


# --------------------------------------------------------------------------
# Single-sample kernel (original module signature): scalar t, x (2,)
# t lives in SMEM; rows are stored directly (no concatenate).
# --------------------------------------------------------------------------
def _vdp_kernel_single(t_ref, x_ref, o_ref):
    # t_ref: (1, 1) f32 SMEM; x_ref/o_ref: (2, 1) f32 VMEM
    t = jnp.full((1, 1), t_ref[0, 0], dtype=jnp.float32)
    x1 = x_ref[0:1, :]
    x2 = x_ref[1:2, :]
    o_ref[0:1, :] = x2                                              # x1_dot
    o_ref[1:2, :] = _MIO * (1.0 - x1 * x1) * x2 - x1 + _A * jnp.sin(_W * t)


def vdp_func2(t, x):
    """t: scalar, x: length-2 state vector. Returns y of shape (2,) float32."""
    t_in = jnp.asarray(t, jnp.float32).reshape(1, 1)
    x_in = jnp.asarray(x, jnp.float32).reshape(2, 1)

    out = pl.pallas_call(
        _vdp_kernel_single,
        out_shape=jax.ShapeDtypeStruct((2, 1), jnp.float32),
        in_specs=[
            pl.BlockSpec(memory_space=pltpu.MemorySpace.SMEM),  # scalar t
            pl.BlockSpec(memory_space=pltpu.MemorySpace.VMEM),  # x (2, 1)
        ],
        out_specs=pl.BlockSpec(memory_space=pltpu.MemorySpace.VMEM),
    )(t_in, x_in)
    return out.reshape(2)


# --------------------------------------------------------------------------
# Pure-JAX references mirroring the PyTorch/numpy forward.
# --------------------------------------------------------------------------
def _reference(t, x):
    x1, x2 = x[0], x[1]
    x1_dot = x2
    x2_dot = _MIO * (1.0 - x1 ** 2) * x2 - x1 + _A * jnp.sin(_W * t)
    return jnp.stack([x1_dot, x2_dot]).astype(jnp.float32)


def _reference_batched(t, x):
    x1, x2 = x[0], x[1]
    x1_dot = x2
    x2_dot = _MIO * (1.0 - x1 ** 2) * x2 - x1 + _A * jnp.sin(_W * t)
    return jnp.stack([x1_dot, x2_dot], axis=0).astype(jnp.float32)


if __name__ == "__main__":
    key = jax.random.PRNGKey(0)
    k_t, k_x, k_tb, k_xb, k_tr, k_xr = jax.random.split(key, 6)

    # --- original module semantics: scalar t, state vector of length 2 ---
    t = jax.random.uniform(k_t, (), jnp.float32) * 5.0
    x = jax.random.normal(k_x, (2,), jnp.float32)
    y = vdp_func2(t, x)
    jax.block_until_ready(y)
    y_ref = _reference(t, x)
    assert y.shape == (2,), f"bad output shape {y.shape}"
    assert jnp.allclose(y, y_ref, atol=1e-5, rtol=1e-5), (y, y_ref)

    # --- batched, dense-plane evaluation: N a multiple of 128 ---
    N = 2048
    tb = jax.random.uniform(k_tb, (N,), jnp.float32) * 10.0
    xb = jax.random.normal(k_xb, (2, N), jnp.float32)
    yb = vdp_func2_batched(tb, xb)
    jax.block_until_ready(yb)
    yb_ref = _reference_batched(tb, xb)
    assert yb.shape == (2, N), f"bad batched output shape {yb.shape}"
    assert jnp.allclose(yb, yb_ref, atol=1e-5, rtol=1e-5)

    # --- ragged batch: exercises wrapper-side padding path ---
    Nr = 300
    tr = jax.random.uniform(k_tr, (Nr,), jnp.float32) * 10.0
    xr = jax.random.normal(k_xr, (2, Nr), jnp.float32)
    yr = vdp_func2_batched(tr, xr)
    jax.block_until_ready(yr)
    yr_ref = _reference_batched(tr, xr)
    assert yr.shape == (2, Nr), f"bad ragged output shape {yr.shape}"
    assert jnp.allclose(yr, yr_ref, atol=1e-5, rtol=1e-5)

    print("KERNEL_OK")
</pallas_src>

<mosaic_0001>
module attributes {stable_mosaic.version = 11 : i64} {
  func.func @_vdp_kernel_single(%arg0: memref<1x1xf32, #tpu.memory_space<smem>>, %arg1: memref<2x1xf32, #tpu.memory_space<vmem>>, %arg2: memref<2x1xf32, #tpu.memory_space<vmem>>) attributes {dimension_semantics = [], scalar_prefetch = 0 : i64, scratch_operands = 0 : i64, tpu.core_type = #tpu.core_type<tc>} {
    %c0 = arith.constant 0 : index
    %c0_0 = arith.constant 0 : index
    %0 = memref.load %arg0[%c0, %c0_0] : memref<1x1xf32, #tpu.memory_space<smem>>
    %1 = vector.broadcast %0 : f32 to vector<1x1xf32>
    %c0_1 = arith.constant 0 : index
    %c0_2 = arith.constant 0 : index
    %2 = vector.load %arg1[%c0_1, %c0_2] : memref<2x1xf32, #tpu.memory_space<vmem>>, vector<1x1xf32>
    %c1 = arith.constant 1 : index
    %c0_3 = arith.constant 0 : index
    %3 = vector.load %arg1[%c1, %c0_3] : memref<2x1xf32, #tpu.memory_space<vmem>>, vector<1x1xf32>
    %c0_4 = arith.constant 0 : index
    %c0_5 = arith.constant 0 : index
    %4 = vector.load %arg2[%c0_4, %c0_5] : memref<2x1xf32, #tpu.memory_space<vmem>>, vector<1x1xf32>
    tpu.vector_store %arg2[%c0_4, %c0_5], %3 {strides = array<i32>} : memref<2x1xf32, #tpu.memory_space<vmem>>, vector<1x1xf32>,
    %5 = arith.mulf %2, %2 : vector<1x1xf32>
    %cst = arith.constant 1.000000e+00 : f32
    %6 = vector.broadcast %cst : f32 to vector<1x1xf32>
    %7 = arith.subf %6, %5 : vector<1x1xf32>
    %cst_6 = arith.constant 5.000000e-01 : f32
    %8 = vector.broadcast %cst_6 : f32 to vector<1x1xf32>
    %9 = arith.mulf %8, %7 : vector<1x1xf32>
    %10 = arith.mulf %9, %3 : vector<1x1xf32>
    %11 = arith.subf %10, %2 : vector<1x1xf32>
    %cst_7 = arith.constant 6.280000e-01 : f32
    %12 = vector.broadcast %cst_7 : f32 to vector<1x1xf32>
    %13 = arith.mulf %12, %1 : vector<1x1xf32>
    %14 = math.sin %13 : vector<1x1xf32>
    %cst_8 = arith.constant 1.200000e+00 : f32
    %15 = vector.broadcast %cst_8 : f32 to vector<1x1xf32>
    %16 = arith.mulf %15, %14 : vector<1x1xf32>
    %17 = arith.addf %11, %16 : vector<1x1xf32>
    %c1_9 = arith.constant 1 : index
    %c0_10 = arith.constant 0 : index
    %18 = vector.load %arg2[%c1_9, %c0_10] : memref<2x1xf32, #tpu.memory_space<vmem>>, vector<1x1xf32>
    tpu.vector_store %arg2[%c1_9, %c0_10], %17 {strides = array<i32>} : memref<2x1xf32, #tpu.memory_space<vmem>>, vector<1x1xf32>,
    return
  }
}

</mosaic_0001>

<bundles_post_ra>
// kernel: tpu_custom_call.1
= control target key start
LH: loop header
LB: loop body
LE: loop exit
PB: predicated region body
PF: predicated region fallthrough
CT: control target
= control target key end

     0   :  { %vm16_vm0 = vcmask 0   ;;  %v196_v20 = vmov 683565275   ;;  %v197_v22 = vmov 2475754826   ;;  %s292_s0 = inlined_call_operand.<no memory space> [shape: f32[1,1], index: 0, kind: input, shape index: {}]   ;;  %s293_s1 = inlined_call_operand.vmem [shape: f32[2,1], index: 1, kind: input, shape index: {}]   ;;  %s294_s2 = inlined_call_operand.vmem [shape: f32[2,1], index: 2, kind: output, shape index: {}]  }
   0x1   :  { %v13_v0 = vstv %s292_s0  ;;  %v224_v1 = vld [vmem:[%s293_s1] sm:$0x1]  ;;  %v15_v2 = vld [vmem:[%s293_s1 + $0x1] sm:$0x1]  ;;  %v198_v24 = vmov 2131351028  }
   0x2   :  { %17 = vst.msk [vmem:[%s294_s2] sm:$0x1] %vm16_vm0, %v15_v2  ;;  %v18_v3 = vmul.f32 %v224_v1, %v224_v1  ;;  %v235_v4 = vmul.f32 0.628, %v13_v0  ;;  %v199_v26 = vmov 2102212464  }
   0x3   :  { %v200_v28 = vmov 920167782   ;;  %v201_v34 = vmov 1326507024  }
   0x4   :  { %v19_v5 = vsub.f32 1.0, %v18_v3  ;;  %v27_v6 = vand.u32 2139095040, %v235_v4  ;;  %v24_v9 = vand.u32 2147483647, %v235_v4  ;;  %vm26_vm13 = vcmp.lt.s32.totalorder %v235_v4, 0 }
   0x6   :  { %v20_v7 = vmul.f32 0.5, %v19_v5  ;;  %v28_v8 = vshrl.u32 %v27_v6, 23  ;;  %v31_v14 = vand.u32 8388607, %v24_v9  ;;  %vm25_vm14 = vcmp.le.f32.partialorder %v24_v9, 0.7853982 }
   0x8   :  { %v239_v10 = vmul.f32 %v20_v7, %v15_v2  ;;  %v186_v11 = vadd.s32 4294967169, %v28_v8  ;;  %v32_v17 = vor.u32 8388608, %v31_v14 }
   0xa   :  { %v22_v12 = vsub.f32 %v239_v10, %v224_v1  ;;  %v34_v13 = vadd.s32 1, %v186_v11  ;;  %v248_v36 = vshll.u32 %v32_v17, 8 }
   0xc   :  { %vm35_vm1 = vcmp.gt.s32.totalorder %v34_v13, 0  ;;  %v73_v48 = vand.u32 65535, %v248_v36  ;;  %v74_v49 = vshrl.u32 %v248_v36, 16 }
   0xd   :  { %v36_v15 = vsel %vm35_vm1, %v34_v13, 0  ;;  %v202_v13 = vmov 0  }
   0xe   :  { %v38_v16 = vand.u32 31, %v36_v15  ;;  %v245_v18 = vshrl.u32 %v36_v15, 5 }
  0x10   :  { %v39_v19 = vsub.s32 32, %v38_v16  ;;  %v41_v21 = vshll.u32 %v196_v20, %v38_v16  ;;  %v44_v23 = vshll.u32 %v197_v22, %v38_v16  ;;  %v47_v25 = vshll.u32 %v198_v24, %v38_v16 }
  0x11   :  { %v50_v27 = vshll.u32 %v199_v26, %v38_v16  ;;  %v53_v29 = vshll.u32 %v200_v28, %v38_v16  ;;  %vm56_vm2 = vcmp.lt.s32.totalorder %v245_v18, 1  ;;  %vm59_vm3 = vcmp.lt.s32.totalorder %v245_v18, 4 }
  0x12   :  { %v42_v30 = vshrl.u32 %v197_v22, %v39_v19  ;;  %v45_v31 = vshrl.u32 %v198_v24, %v39_v19  ;;  %v48_v32 = vshrl.u32 %v199_v26, %v39_v19  ;;  %v51_v33 = vshrl.u32 %v200_v28, %v39_v19 }
  0x13   :  { %v54_v35 = vshrl.u32 %v201_v34, %v39_v19  ;;  %vm58_vm4 = vcmp.lt.s32.totalorder %v245_v18, 3  ;;  %vm57_vm5 = vcmp.lt.s32.totalorder %v245_v18, 2  ;;  %v40_v56 = vshrl.u32 %v196_v20, %v39_v19 }
  0x14   :  { %v43_v37 = vor.u32 %v42_v30, %v41_v21  ;;  %v46_v38 = vor.u32 %v45_v31, %v44_v23  ;;  %v49_v39 = vor.u32 %v48_v32, %v47_v25  ;;  %v52_v40 = vor.u32 %v51_v33, %v50_v27 }
  0x15   :  { %v55_v41 = vor.u32 %v54_v35, %v53_v29 }
  0x16   :  { %v64_v42 = vsel %vm56_vm2, %v43_v37, %v46_v38  ;;  %v68_v43 = vsel %vm56_vm2, %v46_v38, %v49_v39  ;;  %v65_v44 = vsel %vm59_vm3, %v52_v40, 920167782  ;;  %v60_v7 = vsel %vm56_vm2, %v40_v56, %v43_v37 }
  0x17   :  { %v69_v45 = vsel %vm59_vm3, %v55_v41, 1326507024  ;;  %v66_v46 = vsel %vm58_vm4, %v49_v39, %v65_v44  ;;  %v61_v11 = vsel %vm59_vm3, %v49_v39, 2102212464  ;;  %vm167_vm3 = vweird.f32 %v235_v4 }
  0x18   :  { %v70_v47 = vsel %vm58_vm4, %v52_v40, %v69_v45  ;;  %v67_v50 = vsel %vm57_vm5, %v64_v42, %v66_v46  ;;  %v62_v23 = vsel %vm58_vm4, %v46_v38, %v61_v11 }
  0x19   :  { %v71_v51 = vsel %vm57_vm5, %v68_v43, %v70_v47  ;;  %v97_v54 = vand.u32 65535, %v67_v50  ;;  %v98_v55 = vshrl.u32 %v67_v50, 16  ;;  %v63_v31 = vsel %vm57_vm5, %v60_v7, %v62_v23 }
  0x1a   :  { %v75_v52 = vand.u32 65535, %v71_v51  ;;  %v76_v53 = vshrl.u32 %v71_v51, 16  ;;  %v117_v35 = vmul.u32 %v248_v36, %v63_v31 }
  0x1b   :  { %v99_v60 = vmul.u32 %v97_v54, %v73_v48  ;;  %v100_v61 = vmul.u32 %v98_v55, %v73_v48  ;;  %v101_v62 = vmul.u32 %v97_v54, %v74_v49  ;;  %v102_v3 = vmul.u32 %v98_v55, %v74_v49 }
  0x1c   :  { %v77_v57 = vmul.u32 %v75_v52, %v73_v48  ;;  %v78_v58 = vmul.u32 %v76_v53, %v73_v48  ;;  %v79_v59 = vmul.u32 %v75_v52, %v74_v49  ;;  %v80_v63 = vmul.u32 %v76_v53, %v74_v49 }
  0x1d   :  { %v103_v5 = vshll.u32 %v100_v61, 16  ;;  %v105_v6 = vshll.u32 %v101_v62, 16  ;;  %v104_v21 = vshrl.u32 %v100_v61, 16  ;;  %v106_v27 = vshrl.u32 %v101_v62, 16 }
  0x1e   :  { %v81_v0 = vshll.u32 %v78_v58, 16  ;;  %v83_v2 = vshll.u32 %v79_v59, 16  ;;  %v82_v16 = vshrl.u32 %v78_v58, 16  ;;  %v84_v24 = vshrl.u32 %v79_v59, 16 }
  0x1f   :  { %vm107_vm7 = vc.u32 %v99_v60, %v103_v5  ;;  %v109_v15 = vadd.s32 %v103_v5, %v99_v60 }
  0x20   :  { %vm85_vm6 = vc.u32 %v77_v57, %v81_v0  ;;  %v87_v8 = vadd.s32 %v81_v0, %v77_v57  ;;  %v108_v19 = vsel %vm107_vm7, 1, %v202_v13 }
  0x21   :  { %v86_v14 = vsel %vm85_vm6, 1, %v202_v13  ;;  %v110_v22 = vadd.s32 %v108_v19, %v102_v3  ;;  %vm111_vm9 = vc.u32 %v109_v15, %v105_v6  ;;  %v113_v30 = vadd.s32 %v109_v15, %v105_v6 }
  0x22   :  { %v88_v17 = vadd.s32 %v86_v14, %v80_v63  ;;  %vm89_vm8 = vc.u32 %v87_v8, %v83_v2  ;;  %v112_v26 = vsel %vm111_vm9, 1, %v202_v13 }
  0x23   :  { %v90_v20 = vsel %vm89_vm8, 1, %v202_v13  ;;  %v114_v28 = vadd.s32 %v112_v26, %v110_v22 }
  0x24   :  { %v92_v25 = vadd.s32 %v90_v20, %v88_v17 }
  0x25   :  { %v115_v32 = vadd.s32 %v114_v28, %v104_v21 }
  0x26   :  { %v93_v29 = vadd.s32 %v92_v25, %v82_v16 }
  0x27   :  { %v116_v34 = vadd.s32 %v115_v32, %v106_v27 }
  0x28   :  { %v94_v33 = vadd.s32 %v93_v29, %v84_v24 }
  0x29   :  { %v120_v37 = vadd.s32 1, %v116_v34 }
  0x2a   :  { %vm119_vm10 = vc.u32 %v94_v33, %v113_v30  ;;  %v118_v18 = vadd.s32 %v113_v30, %v94_v33 }
  0x2b   :  { %v121_v39 = vsel %vm119_vm10, %v120_v37, %v116_v34 }
  0x2c   :  { %v122_v40 = vadd.s32 %v121_v39, %v117_v35 }
  0x2e   :  { %v123_v38 = vadd.s32 536870912, %v122_v40 }
  0x30   :  { %v124_v41 = vshrl.u32 %v123_v38, 30 }
  0x32   :  { %v125_v42 = vshll.u32 %v124_v41, 30  ;;  %v148_v59 = vsub.s32 4, %v124_v41 }
  0x34   :  { %v126_v43 = vsub.s32 %v122_v40, %v125_v42  ;;  %v149_v62 = vsel %vm26_vm13, %v148_v59, %v124_v41 }
  0x35   :  { %v151_v2 = vsel %vm25_vm14, 0, %v149_v62 }
  0x36   :  { %vm127_vm11 = vcmp.lt.s32.totalorder %v126_v43, 0  ;;  %v128_v44 = vsub.s32 0, %v126_v43  ;;  %v168_v8 = vadd.s32 3, %v151_v2 }
  0x38   :  { %v129_v45 = vsel %vm127_vm11, %v128_v44, %v126_v43  ;;  %v169_v16 = vand.u32 3, %v168_v8 }
  0x39   :  { %v130_v46 = vclz %v129_v45 }
  0x3a   :  { %vm174_vm15 = vcmp.eq.s32.totalorder %v169_v16, 2  ;;  %vm171_vm1 = vcmp.eq.s32.totalorder %v169_v16, 0  ;;  %vm170_vm2 = vcmp.lt.s32.totalorder %v169_v16, 2 }
  0x3b   :  { %v187_v47 = vadd.s32 4294967294, %v130_v46 }
  0x3d   :  { %vm188_vm12 = vcmp.lt.s32.totalorder %v187_v47, 0 }
  0x3e   :  { %v133_v48 = vsel %vm188_vm12, 0, %v187_v47 }
  0x3f   :  { %v134_v49 = vsub.s32 32, %v133_v48  ;;  %v135_v50 = vshll.u32 %v126_v43, %v133_v48  ;;  %v138_v51 = vsub.s32 4294967266, %v133_v48 }
  0x41   :  { %v136_v36 = vshrl.u32 %v118_v18, %v134_v49  ;;  %v139_v52 = vadd.s32 127, %v138_v51 }
  0x43   :  { %v137_v53 = vor.u32 %v136_v36, %v135_v50  ;;  %v140_v54 = vshll.u32 %v139_v52, 23 }
  0x45   :  { %v141_v55 = vor.u32 4788187, %v140_v54  ;;  %v144_v56 = vcvt.s32.f32 %v137_v53 }
  0x47   :  { %v142_v57 = vand.u32 2147483647, %v141_v55 }
  0x49   :  { %v145_v58 = vmul.f32 %v144_v56, %v142_v57 }
  0x4b   :  { %v146_v60 = vxor.u32 2147483648, %v145_v58 }
  0x4d   :  { %v147_v61 = vsel %vm26_vm13, %v146_v60, %v145_v58 }
  0x4e   :  { %v150_v63 = vsel %vm25_vm14, %v235_v4, %v147_v61 }
  0x4f   :  { %v152_v0 = vmul.f32 %v150_v63, %v150_v63 }
  0x51   :  { %v153_v3 = vmul.f32 -0.001358992, %v152_v0  ;;  %v160_v5 = vmul.f32 -0.00019511016, %v152_v0 }
  0x53   :  { %v154_v6 = vadd.f32 0.041655596, %v153_v3  ;;  %v161_v7 = vadd.f32 0.008332121, %v160_v5 }
  0x55   :  { %v155_v11 = vmul.f32 %v154_v6, %v152_v0  ;;  %v162_v13 = vmul.f32 %v161_v7, %v152_v0 }
  0x57   :  { %v156_v14 = vadd.f32 -0.4999988, %v155_v11  ;;  %v163_v15 = vadd.f32 -0.16666654, %v162_v13 }
  0x59   :  { %v157_v17 = vmul.f32 %v156_v14, %v152_v0  ;;  %v164_v19 = vmul.f32 %v163_v15, %v152_v0 }
  0x5b   :  { %v158_v9 = vadd.f32 1.0, %v157_v17  ;;  %v165_v20 = vadd.f32 1.0, %v164_v19 }
  0x5d   :  { %v166_v21 = vmul.f32 %v165_v20, %v150_v63  ;;  %v175_v22 = vxor.u32 2147483648, %v158_v9 }
  0x5f   :  { %v172_v23 = vxor.u32 2147483648, %v166_v21  ;;  %v176_v24 = vsel %vm174_vm15, %v175_v22, %v166_v21 }
  0x61   :  { %v173_v25 = vsel %vm171_vm1, %v158_v9, %v172_v23 }
  0x62   :  { %v177_v26 = vsel %vm170_vm2, %v173_v25, %v176_v24 }
  0x63   :  { %v178_v27 = vsel %vm167_vm3, nan, %v177_v26 }
  0x64   :  { %v179_v28 = vmul.f32 1.2, %v178_v27 }
  0x66   :  { %v180_v29 = vadd.f32 %v179_v28, %v22_v12 }
  0x68   :  { %181 = vst.msk [vmem:[%s294_s2 + $0x1] sm:$0x1] %vm16_vm0, %v180_v29 }

</bundles_post_ra>
